<compile_context>
chip_gen: v7x
topology: tpu7x:2x2x1
jax: 0.10.0
libtpu: 0.0.40
codegen_flags: <defaults>
</compile_context>

<pallas_src>
import jax
import jax.numpy as jnp
from jax.experimental import pallas as pl
from jax.experimental.pallas import tpu as pltpu

_LANES = 128
_CHUNK_ROWS = 128          # rows handled per inner-loop step
_MIB = 1024 * 1024


def _round_down(a: int, m: int) -> int:
    return (a // m) * m


def _round_up(a: int, m: int) -> int:
    return ((a + m - 1) // m) * m


def _hw_params():
    """(block_bytes, vmem_limit_bytes) tuned per TPU generation."""
    vmem = None
    try:
        info = pltpu.get_tpu_info()
        for name in ("vmem_capacity_bytes", "vmem_size_bytes", "vmem_bytes"):
            vmem = getattr(info, name, None)
            if vmem:
                break
    except Exception:
        vmem = None
    if not vmem:
        vmem = 64 * _MIB                       # conservative default (v7x per-TC)
    if vmem >= 100 * _MIB:                     # v5e / v6e: 128 MiB VMEM
        return 16 * _MIB, 96 * _MIB
    return 12 * _MIB, 48 * _MIB                # v7x: 64 MiB per TensorCore


def _fold_window_max(t, w):
    """After log2(w) roll+max folds, one aligned lane per length-`w` lane window
    (its first or last lane, depending on roll's sign convention) holds that
    window's max."""
    d = 1
    while d < w:
        t = jnp.maximum(t, pltpu.roll(t, shift=d, axis=1))
        d *= 2
    return t


def _make_packed_kernel(w, g, block_rows, chunk, in_dtype, unroll):
    """Kernel for a (block_rows, 128) lane-dense tile: g windows of width w/row."""
    n_full = block_rows // chunk
    rem = block_rows - n_full * chunk
    native_bf16 = in_dtype == jnp.bfloat16

    def kernel(x_ref, o_ref):
        # Hoisted constants: 0/1 selection matrices mapping lane -> window.
        lane = jax.lax.broadcasted_iota(jnp.int32, (_LANES, g), 0)
        col = jax.lax.broadcasted_iota(jnp.int32, (_LANES, g), 1)
        sel_last = (lane == col * w + (w - 1)).astype(jnp.float32)
        sel_first = (lane == col * w).astype(jnp.float32)
        # Probe the fold with an iota so the extraction lane (first vs last of
        # each window) is chosen correctly regardless of roll's sign convention.
        probe = _fold_window_max(
            jax.lax.broadcasted_iota(jnp.int32, (8, _LANES), 1), w)
        ends_at_last = probe[0:1, w - 1:w] == (w - 1)           # (1, 1) bool
        sel = jnp.where(ends_at_last, sel_last, sel_first).astype(jnp.bfloat16)

        def process(r0, rows):
            t = x_ref[pl.ds(r0, rows), :]
            if native_bf16:
                # bf16 fold is bit-exact; bf16 x {0,1} accumulated in f32 is
                # exact -> single DEFAULT-precision MXU pass.
                f = _fold_window_max(t, w)
                out = jnp.dot(f, sel, preferred_element_type=jnp.float32)
            else:
                # f32 (and other float) path: exact 3-way bf16 split of the
                # folded tile; three DEFAULT-precision matmuls summed in f32.
                # Cost of Precision.HIGH, exactness of HIGHEST.
                f = _fold_window_max(t.astype(jnp.float32), w)
                hi = f.astype(jnp.bfloat16)
                r1 = f - hi.astype(jnp.float32)
                mid = r1.astype(jnp.bfloat16)
                lo = (r1 - mid.astype(jnp.float32)).astype(jnp.bfloat16)
                out = (jnp.dot(hi, sel, preferred_element_type=jnp.float32)
                       + jnp.dot(mid, sel, preferred_element_type=jnp.float32)
                       + jnp.dot(lo, sel, preferred_element_type=jnp.float32))
            o_ref[pl.ds(r0, rows), :] = out.astype(o_ref.dtype)

        if n_full > 0:
            def body(j, carry):
                process(pl.multiple_of(j * chunk, chunk), chunk)
                return carry
            jax.lax.fori_loop(0, n_full, body, 0, unroll=unroll)
        if rem > 0:
            process(n_full * chunk, rem)

    return kernel


def _pool_packed(x, block_bytes, vmem_limit):
    """Lane-packed fast path: W | 128, floating dtype."""
    n, c, h, w = x.shape
    m = n * c * h
    g = _LANES // w

    x2 = x.reshape(m, w)                       # free (contiguous) reshape
    pad_rows = (-m) % g
    if pad_rows:
        # Rare (costs one extra pass over the input).  Pad rows form whole fake
        # windows that never touch a real window's max; their outputs are
        # sliced off below.  TODO(synk): bulk + tiny-tail split to avoid it.
        x2 = jnp.pad(x2, ((0, pad_rows), (0, 0)))
    r = (m + pad_rows) // g
    x_packed = x2.reshape(r, g * w)            # last dim == 128 (lane-dense)

    itemsize = x.dtype.itemsize
    chunk = _CHUNK_ROWS
    br_target = max(chunk, _round_down(block_bytes // (_LANES * itemsize), chunk))
    if r <= chunk:
        block_rows = r                         # single block == full array dims
    else:
        floor_r = _round_down(r, chunk)
        block_rows = min(br_target, floor_r)
        if pl.cdiv(r, block_rows) < 2:
            # Give the v7x megacore (2 TensorCores) at least two blocks of work.
            block_rows = min(floor_r, max(chunk, _round_up(pl.cdiv(r, 2), chunk)))
    num_blocks = pl.cdiv(r, block_rows)
    n_full = block_rows // chunk
    unroll = max(1, min(4, n_full))

    cost = pl.CostEstimate(
        flops=m * w,
        transcendentals=0,
        bytes_accessed=r * _LANES * itemsize + r * g * itemsize,
    )

    out = pl.pallas_call(
        _make_packed_kernel(w, g, block_rows, chunk, x.dtype, unroll),
        out_shape=jax.ShapeDtypeStruct((r, g), x.dtype),
        grid=(num_blocks,),
        in_specs=[pl.BlockSpec((block_rows, g * w), lambda i: (i, 0))],
        out_specs=pl.BlockSpec((block_rows, g), lambda i: (i, 0)),
        compiler_params=pltpu.CompilerParams(
            dimension_semantics=("parallel",),
            vmem_limit_bytes=vmem_limit,
        ),
        cost_estimate=cost,
    )(x_packed)

    flat = out.reshape(r * g)
    if pad_rows:
        flat = flat[:m]
    return flat.reshape(n, c, h, 1)


def _rows_kernel(x_ref, o_ref):
    o_ref[...] = jnp.max(x_ref[...], axis=1, keepdims=True)


def _pool_rows(x, block_bytes, vmem_limit):
    """General fallback: one pooling window per VMEM-tile row (lane axis = W)."""
    # TODO(synk): extend lane-packing to W not dividing 128 (load g*W lanes,
    # pad to 128 in-register with -inf) to retire this path for 2 <= W <= 128.
    # TODO(synk): for very large W, add a W-chunked reduction grid axis with a
    # VMEM accumulator instead of keeping the whole row in one block.
    n, c, h, w = x.shape
    m = n * c * h
    x2 = x.reshape(m, w)
    itemsize = x.dtype.itemsize

    bm_target = max(8, _round_down(max(block_bytes // (w * itemsize), 8), 8))
    bm = m if m <= bm_target else bm_target

    cost = pl.CostEstimate(
        flops=m * w,
        transcendentals=0,
        bytes_accessed=m * w * itemsize + m * itemsize,
    )

    out = pl.pallas_call(
        _rows_kernel,
        out_shape=jax.ShapeDtypeStruct((m, 1), x.dtype),
        grid=(pl.cdiv(m, bm),),
        in_specs=[pl.BlockSpec((bm, w), lambda i: (i, 0))],
        out_specs=pl.BlockSpec((bm, 1), lambda i: (i, 0)),
        compiler_params=pltpu.CompilerParams(
            dimension_semantics=("parallel",),
            vmem_limit_bytes=vmem_limit,
        ),
        cost_estimate=cost,
    )(x2)
    return out.reshape(n, c, h, 1)


def horizontal_max_pool2d(x):
    """Equivalent of nn.functional.max_pool2d(x, kernel_size=(1, x.shape[3]))."""
    if x.ndim != 4:
        raise ValueError(f"expected NCHW input, got shape {x.shape}")
    n, c, h, w = x.shape
    if n * c * h == 0:
        return jnp.zeros((n, c, h, 1), x.dtype)
    if w == 1:
        return x                               # max over a single column
    block_bytes, vmem_limit = _hw_params()
    packable = (
        2 <= w <= _LANES
        and _LANES % w == 0
        and jnp.issubdtype(x.dtype, jnp.floating)
        and x.dtype.itemsize <= 4
    )
    if packable:
        return _pool_packed(x, block_bytes, vmem_limit)
    return _pool_rows(x, block_bytes, vmem_limit)


if __name__ == "__main__":
    key = jax.random.PRNGKey(0)
    k1, k2, k3, k4 = jax.random.split(key, 4)

    def check(x):
        out = jax.block_until_ready(horizontal_max_pool2d(x))
        ref = jnp.max(x, axis=3, keepdims=True)
        assert out.shape == ref.shape, (out.shape, ref.shape)
        assert out.dtype == x.dtype, (out.dtype, x.dtype)
        assert jnp.allclose(out.astype(jnp.float32), ref.astype(jnp.float32)), (
            f"mismatch vs reference for shape {x.shape} dtype {x.dtype}")

    # Primary small case (packed f32 path, single full-array block).
    check(jax.random.normal(k1, (2, 4, 16, 16), dtype=jnp.float32))
    # Multi-block grid with a ragged last block (no host-side padding).
    check(jax.random.normal(k2, (2, 8, 250, 16), dtype=jnp.float32))
    # Native-bf16 packed path (single DEFAULT-precision MXU pass).
    check(jax.random.normal(k3, (2, 4, 16, 32), dtype=jnp.bfloat16))
    # W does not divide 128 -> row-blocked fallback.
    check(jax.random.normal(k4, (2, 3, 5, 12), dtype=jnp.float32))

    print("KERNEL_OK")
</pallas_src>

<mosaic_0001>
module attributes {stable_mosaic.version = 11 : i64} {
  func.func @kernel(%arg0: i32, %arg1: memref<16x128xf32, #tpu.memory_space<vmem>>, %arg2: memref<16x8xf32, #tpu.memory_space<vmem>>) attributes {dimension_semantics = [#tpu.dimension_semantics<parallel>], iteration_bounds = array<i64: 1>, scalar_prefetch = 0 : i64, scratch_operands = 0 : i64, tpu.core_type = #tpu.core_type<tc>, window_params = [{transform_indices = @transform_0, window_bounds = array<i64: 16, 128>}, {transform_indices = @transform_1, window_bounds = array<i64: 16, 8>}]} {
    %0 = tpu.iota {dimensions = array<i32: 0>} : vector<128x8xi32>
    %1 = tpu.iota {dimensions = array<i32: 1>} : vector<128x8xi32>
    %c16_i32 = arith.constant 16 : i32
    %2 = vector.broadcast %c16_i32 : i32 to vector<128x8xi32>
    %3 = arith.muli %1, %2 : vector<128x8xi32>
    %c15_i32 = arith.constant 15 : i32
    %4 = vector.broadcast %c15_i32 : i32 to vector<128x8xi32>
    %5 = arith.addi %3, %4 : vector<128x8xi32>
    %6 = arith.cmpi eq, %0, %5 : vector<128x8xi32>
    %7 = arith.extui %6 : vector<128x8xi1> to vector<128x8xi32>
    %8 = arith.sitofp %7 : vector<128x8xi32> to vector<128x8xf32>
    %c16_i32_0 = arith.constant 16 : i32
    %9 = vector.broadcast %c16_i32_0 : i32 to vector<128x8xi32>
    %10 = arith.muli %1, %9 : vector<128x8xi32>
    %11 = arith.cmpi eq, %0, %10 : vector<128x8xi32>
    %12 = arith.extui %11 : vector<128x8xi1> to vector<128x8xi32>
    %13 = arith.sitofp %12 : vector<128x8xi32> to vector<128x8xf32>
    %14 = tpu.iota {dimensions = array<i32: 1>} : vector<8x128xi32>
    %c1_i32 = arith.constant 1 : i32
    %15 = tpu.dynamic_rotate %14 by %c1_i32 dim 1 : vector<8x128xi32>, i32 -> vector<8x128xi32>
    %16 = arith.maxsi %14, %15 : vector<8x128xi32>
    %c2_i32 = arith.constant 2 : i32
    %17 = tpu.dynamic_rotate %16 by %c2_i32 dim 1 : vector<8x128xi32>, i32 -> vector<8x128xi32>
    %18 = arith.maxsi %16, %17 : vector<8x128xi32>
    %c4_i32 = arith.constant 4 : i32
    %19 = tpu.dynamic_rotate %18 by %c4_i32 dim 1 : vector<8x128xi32>, i32 -> vector<8x128xi32>
    %20 = arith.maxsi %18, %19 : vector<8x128xi32>
    %c8_i32 = arith.constant 8 : i32
    %21 = tpu.dynamic_rotate %20 by %c8_i32 dim 1 : vector<8x128xi32>, i32 -> vector<8x128xi32>
    %22 = arith.maxsi %20, %21 : vector<8x128xi32>
    %23 = vector.extract_strided_slice %22 {offsets = [0, 15], sizes = [1, 1], strides = [1, 1]} : vector<8x128xi32> to vector<1x1xi32>
    %c15_i32_1 = arith.constant 15 : i32
    %24 = vector.broadcast %c15_i32_1 : i32 to vector<1x1xi32>
    %25 = arith.cmpi eq, %23, %24 : vector<1x1xi32>
    %26 = vector.shape_cast %25 : vector<1x1xi1> to vector<1x1xi1>
    %27 = vector.broadcast %26 : vector<1x1xi1> to vector<128x8xi1>
    %28 = arith.select %27, %8, %13 : vector<128x8xi1>, vector<128x8xf32>
    %29 = arith.truncf %28 : vector<128x8xf32> to vector<128x8xbf16>
    %c0 = arith.constant 0 : index
    %c0_2 = arith.constant 0 : index
    %30 = vector.load %arg1[%c0, %c0_2] : memref<16x128xf32, #tpu.memory_space<vmem>>, vector<16x128xf32>
    %c1_i32_3 = arith.constant 1 : i32
    %31 = tpu.dynamic_rotate %30 by %c1_i32_3 dim 1 : vector<16x128xf32>, i32 -> vector<16x128xf32>
    %32 = arith.maximumf %30, %31 : vector<16x128xf32>
    %c2_i32_4 = arith.constant 2 : i32
    %33 = tpu.dynamic_rotate %32 by %c2_i32_4 dim 1 : vector<16x128xf32>, i32 -> vector<16x128xf32>
    %34 = arith.maximumf %32, %33 : vector<16x128xf32>
    %c4_i32_5 = arith.constant 4 : i32
    %35 = tpu.dynamic_rotate %34 by %c4_i32_5 dim 1 : vector<16x128xf32>, i32 -> vector<16x128xf32>
    %36 = arith.maximumf %34, %35 : vector<16x128xf32>
    %c8_i32_6 = arith.constant 8 : i32
    %37 = tpu.dynamic_rotate %36 by %c8_i32_6 dim 1 : vector<16x128xf32>, i32 -> vector<16x128xf32>
    %38 = arith.maximumf %36, %37 : vector<16x128xf32>
    %39 = arith.truncf %38 : vector<16x128xf32> to vector<16x128xbf16>
    %40 = arith.extf %39 : vector<16x128xbf16> to vector<16x128xf32>
    %41 = arith.subf %38, %40 : vector<16x128xf32>
    %42 = arith.truncf %41 : vector<16x128xf32> to vector<16x128xbf16>
    %43 = arith.extf %42 : vector<16x128xbf16> to vector<16x128xf32>
    %44 = arith.subf %41, %43 : vector<16x128xf32>
    %45 = arith.truncf %44 : vector<16x128xf32> to vector<16x128xbf16>
    %cst = arith.constant dense<0.000000e+00> : vector<16x8xf32>
    %46 = tpu.matmul %39, %29, %cst {dimension_numbers = #tpu.dot_dimension_numbers<[1], [0], [0], [1], [0, 0, 1, 1], [], []>} : vector<16x128xbf16>, vector<128x8xbf16>, vector<16x8xf32> -> vector<16x8xf32>
    %cst_7 = arith.constant dense<0.000000e+00> : vector<16x8xf32>
    %47 = tpu.matmul %42, %29, %cst_7 {dimension_numbers = #tpu.dot_dimension_numbers<[1], [0], [0], [1], [0, 0, 1, 1], [], []>} : vector<16x128xbf16>, vector<128x8xbf16>, vector<16x8xf32> -> vector<16x8xf32>
    %48 = arith.addf %46, %47 : vector<16x8xf32>
    %cst_8 = arith.constant dense<0.000000e+00> : vector<16x8xf32>
    %49 = tpu.matmul %45, %29, %cst_8 {dimension_numbers = #tpu.dot_dimension_numbers<[1], [0], [0], [1], [0, 0, 1, 1], [], []>} : vector<16x128xbf16>, vector<128x8xbf16>, vector<16x8xf32> -> vector<16x8xf32>
    %50 = arith.addf %48, %49 : vector<16x8xf32>
    %c0_9 = arith.constant 0 : index
    %c0_10 = arith.constant 0 : index
    %51 = vector.load %arg2[%c0_9, %c0_10] : memref<16x8xf32, #tpu.memory_space<vmem>>, vector<16x8xf32>
    tpu.vector_store %arg2[%c0_9, %c0_10], %50 {strides = array<i32>} : memref<16x8xf32, #tpu.memory_space<vmem>>, vector<16x8xf32>,
    return
  }
  func.func @transform_0(%arg0: i32) -> (i32, i32) {
    %c0_i32 = arith.constant 0 : i32
    %c0_i32_0 = arith.constant 0 : i32
    return %arg0, %c0_i32 : i32, i32
  }
  func.func @transform_1(%arg0: i32) -> (i32, i32) {
    %c0_i32 = arith.constant 0 : i32
    %c0_i32_0 = arith.constant 0 : i32
    return %arg0, %c0_i32 : i32, i32
  }
}

</mosaic_0001>

<bundles_post_ra>
// kernel: tpu_custom_call.1
= control target key start
LH: loop header
LB: loop body
LE: loop exit
PB: predicated region body
PF: predicated region fallthrough
CT: control target
= control target key end

     0   :  { %6 = vsyncpa [#allocation3], 0  ;;  %s518_s6 = smov [#allocation2]   ;;  %s742_s0 = inlined_call_operand.hbm [shape: f32[16,128], index: 0, kind: input, shape index: {}]   ;;  %s743_s1 = inlined_call_operand.vmem [shape: f32[16,8], index: 1, kind: output, shape index: {}]  }
   0x1   :  { %s12_s7 = sshll.u32 %s518_s6, 4  ;;  %s494_s10 = scalar_lea.hbm %s742_s0, 256  ;;  %s13_s7 = int_to_ptr.vmem [resolvable:$true] %s12_s7 }
   0x2   :  { %p495_p0 = scmp.ne.s32.totalorder %s742_s0, %s494_s10  ;;  %p498_p1 = scmp.lt.u32.totalorder %s494_s10, %s742_s0 }
   0x4   :  { %p500_p2 = pnand %p498_p1, %p495_p0 }
   0x6   :  { %503 = shalt.err (!%p500_p2)
}
   0x7   :  { %s504_s15 = scalar_lea.vmem %s13_s7, 256  ;;  %p509_p4 = scmp.lt.s32.totalorder %s13_s7, %s13_s7 }
   0x8   :  { %p505_p3 = scmp.ne.s32.totalorder %s13_s7, %s504_s15  ;;  %p510_p5 = scmp.lt.s32.totalorder %s504_s15, %s504_s15 }
   0xa   :  { %p511_p6 = por %p510_p5, %p509_p4 }
   0xc   :  { %p512_p7 = pnand %p511_p6, %p505_p3 }
   0xe   :  { %515 = shalt.err (!%p512_p7)
}
   0xf   :  { %s519_s16 = smov 128   ;;  %s520_s17 = smov 8   ;;  %v23_v0 = vlaneseq }
  0x10   :  { %18 = dma.hbm_to_vmem [thread:$0]  %s742_s0, 256, %s13_s7, [#allocation3], %s519_s16, %s519_s16, %s520_s17  }
  0x11   :  { %516 = dma.done.wait [#allocation3], 256  }
  0x12   :  { %517 = vsyncadd [#allocation3], 4294967040  ;;  %v41_v1 = vand.u32 127, %v23_v0  ;;  %s521_s20 = smov 1   ;;  %s522_s21 = smov 2   ;;  %v188_v4 = vld [vmem:[#allocation2 + $0x8] sm:$0xff] }
  0x13   :  { %s523_s22 = smov 4   ;;  %v187_v7 = vld [vmem:[#allocation2] sm:$0xff]  ;;  %v524_v18 = vmov 0   ;;  %s525_s0 = smov 113   ;;  %v526_v22 = vmov 0.0   ;;  %vm527_vm5 = vmmov 0  }
  0x14   :  { %140 = vrot.lane.b32.xlu0 %v41_v1, %s521_s20  ;;  %416 = vmatprep.subr.bf16.mxu1 %v526_v22  ;;  %v566_v28 = vmul.u32 16, %v41_v1  ;;  %v568_v29 = vshrl.u32 %v23_v0, 7 }
  0x15   :  { %436 = vmatprep.subr.bf16.mxu0 %v526_v22  ;;  %452 = vmatprep.mubr.msk.bf16.mxu0 %vm527_vm5, %v526_v22 }
  0x16   :  { %432 = vmatprep.mubr.msk.bf16.mxu1 %vm527_vm5, %v526_v22  ;;  %v571_v30 = vadd.s32 15, %v566_v28  ;;  %v25_v31 = vadd.s32 8, %v568_v29  ;;  %v26_v32 = vadd.s32 16, %v568_v29  ;;  %v27_v33 = vadd.s32 24, %v568_v29 }
  0x17   :  { %v28_v34 = vadd.s32 32, %v568_v29  ;;  %vm92_vm8 = vcmp.eq.s32.totalorder %v568_v29, %v566_v28  ;;  %v29_v35 = vadd.s32 40, %v568_v29  ;;  %v30_v37 = vadd.s32 48, %v568_v29 }
  0x18   :  { %vm44_vm6 = vcmp.eq.s32.totalorder %v568_v29, %v571_v30  ;;  %vm45_vm7 = vcmp.eq.s32.totalorder %v25_v31, %v571_v30  ;;  %vm93_vm9 = vcmp.eq.s32.totalorder %v25_v31, %v566_v28  ;;  %vm46_vm10 = vcmp.eq.s32.totalorder %v26_v32, %v571_v30 }
  0x19   :  { %vm47_vm11 = vcmp.eq.s32.totalorder %v27_v33, %v571_v30  ;;  %vm94_vm12 = vcmp.eq.s32.totalorder %v26_v32, %v566_v28  ;;  %v357_v36 = vsel %vm44_vm6, 1.0, %v526_v22  ;;  %vm95_vm13 = vcmp.eq.s32.totalorder %v27_v33, %v566_v28 }
  0x1a   :  { %v31_v38 = vadd.s32 56, %v568_v29  ;;  %v358_v39 = vsel %vm45_vm7, 1.0, %v526_v22  ;;  %v373_v40 = vsel %vm92_vm8, 1.0, %v526_v22  ;;  %v374_v41 = vsel %vm93_vm9, 1.0, %v526_v22 }
  0x1b   :  { %v359_v42 = vsel %vm46_vm10, 1.0, %v526_v22  ;;  %v360_v44 = vsel %vm47_vm11, 1.0, %v526_v22  ;;  %v375_v45 = vsel %vm94_vm12, 1.0, %v526_v22  ;;  %vm48_vm14 = vcmp.eq.s32.totalorder %v28_v34, %v571_v30 }
  0x1c   :  { %v376_v47 = vsel %vm95_vm13, 1.0, %v526_v22  ;;  %v361_v51 = vsel %vm48_vm14, 1.0, %v526_v22  ;;  %v32_v57 = vadd.s32 64, %v568_v29  ;;  %vm98_vm6 = vcmp.eq.s32.totalorder %v30_v37, %v566_v28 }
  0x1d   :  { %vm99_vm7 = vcmp.eq.s32.totalorder %v31_v38, %v566_v28  ;;  %v33_v58 = vadd.s32 72, %v568_v29  ;;  %v379_v0 = vsel %vm98_vm6, 1.0, %v526_v22 }
  0x1e   :  { %vm52_vm8 = vcmp.eq.s32.totalorder %v32_v57, %v571_v30  ;;  %vm100_vm10 = vcmp.eq.s32.totalorder %v32_v57, %v566_v28 }
  0x1f   :  { %vm53_vm9 = vcmp.eq.s32.totalorder %v33_v58, %v571_v30  ;;  %vm101_vm11 = vcmp.eq.s32.totalorder %v33_v58, %v566_v28 }
  0x86   :  { %v141_v2 = vpop.permute.xlu0 %140 }
  0x87   :  { %vm142_vm0 = vcmp.gt.s32.totalorder %v41_v1, %v141_v2 }
  0x88   :  { %v143_v3 = vsel %vm142_vm0, %v41_v1, %v141_v2  ;;  %vm49_vm0 = vcmp.eq.s32.totalorder %v29_v35, %v571_v30  ;;  %v380_v1 = vsel %vm99_vm7, 1.0, %v526_v22  ;;  %v34_v2 = vadd.s32 80, %v568_v29 }
  0x89   :  { %144 = vrot.lane.b32.xlu0 %v143_v3, %s522_s21  ;;  %v362_v54 = vsel %vm49_vm0, 1.0, %v526_v22 }
  0x8a   :  { %vm54_vm12 = vcmp.eq.s32.totalorder %v34_v2, %v571_v30  ;;  %vm102_vm14 = vcmp.eq.s32.totalorder %v34_v2, %v566_v28 }
  0x8d   :  { %191 = vrot.lane.b32.xlu0 %v188_v4, %s521_s20 }
  0xfb   :  { %v145_v5 = vpop.permute.xlu0 %144 }
  0xfc   :  { %vm146_vm1 = vcmp.gt.s32.totalorder %v143_v3, %v145_v5 }
  0xfd   :  { %v147_v6 = vsel %vm146_vm1, %v143_v3, %v145_v5  ;;  %vm96_vm1 = vcmp.eq.s32.totalorder %v28_v34, %v566_v28  ;;  %v35_v3 = vadd.s32 88, %v568_v29 }
  0xfe   :  { %148 = vrot.lane.b32.xlu1 %v147_v6, %s523_s22  ;;  %v377_v55 = vsel %vm96_vm1, 1.0, %v526_v22 }
  0xff   :  { %v192_v9 = vpop.permute.xlu0 %191  ;;  %vm55_vm13 = vcmp.eq.s32.totalorder %v35_v3, %v571_v30  ;;  %vm103_vm0 = vcmp.eq.s32.totalorder %v35_v3, %v566_v28 }
 0x100   :  { %v194_v11 = vmax.f32 %v188_v4, %v192_v9  ;;  %v366_v9 = vsel %vm53_vm9, 1.0, %v526_v22 }
 0x102   :  { %189 = vrot.lane.b32.xlu1 %v187_v7, %s521_s20 }
 0x170   :  { %v149_v8 = vpop.permute.xlu1 %148 }
 0x171   :  { %vm150_vm2 = vcmp.gt.s32.totalorder %v147_v6, %v149_v8 }
 0x172   :  { %v151_v10 = vsel %vm150_vm2, %v147_v6, %v149_v8  ;;  %vm97_vm2 = vcmp.eq.s32.totalorder %v29_v35, %v566_v28  ;;  %v36_v8 = vadd.s32 96, %v568_v29 }
 0x173   :  { %152 = vrot.lane.b32.xlu1 %v151_v10, %s520_s17  ;;  %v378_v56 = vsel %vm97_vm2, 1.0, %v526_v22 }
 0x174   :  { %v190_v12 = vpop.permute.xlu1 %189  ;;  %vm56_vm1 = vcmp.eq.s32.totalorder %v36_v8, %v571_v30 }
 0x175   :  { %v193_v13 = vmax.f32 %v187_v7, %v190_v12  ;;  %v365_v7 = vsel %vm52_vm8, 1.0, %v526_v22  ;;  %v37_v12 = vadd.s32 104, %v568_v29  ;;  %v369_v31 = vsel %vm56_vm1, 1.0, %v526_v22 }
 0x177   :  { %197 = vrot.lane.b32.xlu1 %v194_v11, %s522_s21  ;;  %195 = vrot.lane.b32.xlu0 %v193_v13, %s522_s21  ;;  %vm57_vm2 = vcmp.eq.s32.totalorder %v37_v12, %v571_v30 }
 0x178   :  { %v370_v32 = vsel %vm57_vm2, 1.0, %v526_v22 }
 0x1e5   :  { %v153_v14 = vpop.permute.xlu1 %152 }
 0x1e6   :  { %vm154_vm3 = vcmp.gt.s32.totalorder %v151_v10, %v153_v14 }
 0x1e7   :  { %v155_v15 = vsel %vm154_vm3, %v151_v10, %v153_v14  ;;  %vm50_vm3 = vcmp.eq.s32.totalorder %v30_v37, %v571_v30  ;;  %v381_v10 = vsel %vm100_vm10, 1.0, %v526_v22 }
 0x1e8   :  { %vm156_vm4 = vcmp.eq.s32.totalorder %v155_v15, 15  ;;  %v363_v62 = vsel %vm50_vm3, 1.0, %v526_v22  ;;  %vm104_vm3 = vcmp.eq.s32.totalorder %v36_v8, %v566_v28 }
 0x1e9   :  { %v196_v16 = vpop.permute.xlu0 %195  ;;  %v198_v17 = vpop.permute.xlu1 %197  ;;  %v157_v19 = vsel %vm156_vm4, 1, %v524_v18  ;;  %vm51_vm4 = vcmp.eq.s32.totalorder %v31_v38, %v571_v30  ;;  %v368_v18 = vsel %vm55_vm13, 1.0, %v526_v22  ;;  %v385_v33 = vsel %vm104_vm3, 1.0, %v526_v22 }
 0x1ea   :  { %v199_v20 = vmax.f32 %v193_v13, %v196_v16  ;;  %158 = vrot.lane.b32.xlu0 %v157_v19, %s525_s0  ;;  %v200_v21 = vmax.f32 %v194_v11, %v198_v17  ;;  %v364_v63 = vsel %vm51_vm4, 1.0, %v526_v22  ;;  %v382_v11 = vsel %vm101_vm11, 1.0, %v526_v22 }
 0x1eb   :  { %v367_v16 = vsel %vm54_vm12, 1.0, %v526_v22  ;;  %v38_v17 = vadd.s32 112, %v568_v29  ;;  %v383_v19 = vsel %vm102_vm14, 1.0, %v526_v22  ;;  %vm105_vm4 = vcmp.eq.s32.totalorder %v37_v12, %v566_v28 }
 0x1ec   :  { %201 = vrot.lane.b32.xlu1 %v199_v20, %s523_s22  ;;  %v386_v34 = vsel %vm105_vm4, 1.0, %v526_v22 }
 0x1ed   :  { %vm58_vm6 = vcmp.eq.s32.totalorder %v38_v17, %v571_v30  ;;  %vm106_vm8 = vcmp.eq.s32.totalorder %v38_v17, %v566_v28 }
 0x1ee   :  { %203 = vrot.lane.b32.xlu0 %v200_v21, %s523_s22  ;;  %v371_v37 = vsel %vm58_vm6, 1.0, %v526_v22 }
 0x25c   :  { %v159_v23 = vpop.permute.xlu0 %158 }
 0x25d   :  { %482 = vpush %v159_v23 }
 0x25e   :  { %v202_v24 = vpop.permute.xlu1 %201 }
 0x25f   :  { %v558_v25 = vmax.f32 %v199_v20, %v202_v24  ;;  %v384_v20 = vsel %vm103_vm0, 1.0, %v526_v22 }
 0x260   :  { %v204_v26 = vpop.permute.xlu0 %203 }
 0x261   :  { %v560_v27 = vmax.f32 %v200_v21, %v204_v26  ;;  %207 = vrot.lane.b32.xlu1 %v558_v25, %s520_s17  ;;  %v39_v21 = vadd.s32 120, %v568_v29 }
 0x263   :  { %209 = vrot.lane.b32.xlu0 %v560_v27, %s520_s17  ;;  %vm59_vm7 = vcmp.eq.s32.totalorder %v39_v21, %v571_v30  ;;  %vm107_vm9 = vcmp.eq.s32.totalorder %v39_v21, %v566_v28 }
 0x264   :  { %v372_v38 = vsel %vm59_vm7, 1.0, %v526_v22  ;;  %v388_v30 = vsel %vm107_vm9, 1.0, %v526_v22 }
 0x28e   :  { %s483_s23 = spop %482 }
 0x28f   :  { %v161_v43 = vstv %s483_s23 }
 0x290   :  { %vm598_vm15 = vcmp.eq.s32.totalorder %v161_v43, 1 }
 0x291   :  { %v163_v48 = vsel %vm598_vm15, %v357_v36, %v373_v40  ;;  %v164_v49 = vsel %vm598_vm15, %v358_v39, %v374_v41  ;;  %v165_v52 = vsel %vm598_vm15, %v359_v42, %v375_v45  ;;  %v166_v53 = vsel %vm598_vm15, %v360_v44, %v376_v47 }
 0x292   :  { %v610_v50 = vpack.c.bf16 %v164_v49, %v163_v48  ;;  %v630_v59 = vpack.c.bf16 %v166_v53, %v165_v52  ;;  %v167_v60 = vsel %vm598_vm15, %v361_v51, %v377_v55  ;;  %v168_v61 = vsel %vm598_vm15, %v362_v54, %v378_v56 }
 0x293   :  { %v650_v4 = vpack.c.bf16 %v168_v61, %v167_v60  ;;  %v169_v5 = vsel %vm598_vm15, %v363_v62, %v379_v0  ;;  %v170_v6 = vsel %vm598_vm15, %v364_v63, %v380_v1  ;;  %v171_v14 = vsel %vm598_vm15, %v365_v7, %v381_v10 }
 0x294   :  { %417 = vmatpush3.bf16.msra.mxu1 %v610_v50  ;;  %437 = vmatpush3.bf16.msra.mxu0 %v610_v50  ;;  %v670_v13 = vpack.c.bf16 %v170_v6, %v169_v5  ;;  %v172_v15 = vsel %vm598_vm15, %v366_v9, %v382_v11  ;;  %v173_v24 = vsel %vm598_vm15, %v367_v16, %v383_v19  ;;  %v387_v39 = vsel %vm106_vm8, 1.0, %v526_v22 }
 0x295   :  { %418 = vmatprep.subr.bf16.mxu1 %v526_v22  ;;  %438 = vmatprep.subr.bf16.mxu0 %v526_v22  ;;  %v183_v23 = vpack.c.bf16 %v172_v15, %v171_v14  ;;  %v174_v26 = vsel %vm598_vm15, %v368_v18, %v384_v20  ;;  %v175_v35 = vsel %vm598_vm15, %v369_v31, %v385_v33 }
 0x296   :  { %v184_v29 = vpack.c.bf16 %v174_v26, %v173_v24  ;;  %v176_v36 = vsel %vm598_vm15, %v370_v32, %v386_v34  ;;  %v177_v40 = vsel %vm598_vm15, %v371_v37, %v387_v39  ;;  %v178_v41 = vsel %vm598_vm15, %v372_v38, %v388_v30 }
 0x297   :  { %v185_v28 = vpack.c.bf16 %v176_v36, %v175_v35  ;;  %v186_v42 = vpack.c.bf16 %v178_v41, %v177_v40 }
 0x298   :  { %419 = vmatpush3.bf16.msra.mxu1 %v630_v59  ;;  %439 = vmatpush3.bf16.msra.mxu0 %v630_v59 }
 0x299   :  { %420 = vmatprep.subr.bf16.mxu1 %v526_v22  ;;  %440 = vmatprep.subr.bf16.mxu0 %v526_v22 }
 0x29c   :  { %421 = vmatpush3.bf16.msra.mxu1 %v650_v4  ;;  %441 = vmatpush3.bf16.msra.mxu0 %v650_v4 }
 0x29d   :  { %422 = vmatprep.subr.bf16.mxu1 %v526_v22  ;;  %442 = vmatprep.subr.bf16.mxu0 %v526_v22 }
 0x2a0   :  { %423 = vmatpush3.bf16.msra.mxu1 %v670_v13  ;;  %443 = vmatpush3.bf16.msra.mxu0 %v670_v13 }
 0x2a1   :  { %424 = vmatprep.subr.bf16.mxu1 %v526_v22  ;;  %444 = vmatprep.subr.bf16.mxu0 %v526_v22 }
 0x2a4   :  { %425 = vmatpush3.bf16.msra.mxu1 %v183_v23  ;;  %445 = vmatpush3.bf16.msra.mxu0 %v183_v23 }
 0x2a5   :  { %426 = vmatprep.subr.bf16.mxu1 %v526_v22  ;;  %446 = vmatprep.subr.bf16.mxu0 %v526_v22 }
 0x2a8   :  { %427 = vmatpush3.bf16.msra.mxu1 %v184_v29  ;;  %447 = vmatpush3.bf16.msra.mxu0 %v184_v29 }
 0x2a9   :  { %428 = vmatprep.subr.bf16.mxu1 %v526_v22  ;;  %448 = vmatprep.subr.bf16.mxu0 %v526_v22 }
 0x2ac   :  { %429 = vmatpush3.bf16.msra.mxu1 %v185_v28  ;;  %449 = vmatpush3.bf16.msra.mxu0 %v185_v28 }
 0x2ad   :  { %430 = vmatprep.subr.bf16.mxu1 %v526_v22  ;;  %450 = vmatprep.subr.bf16.mxu0 %v526_v22 }
 0x2b0   :  { %431 = vmatpush3.bf16.msra.mxu1 %v186_v42  ;;  %451 = vmatpush3.bf16.msra.mxu0 %v186_v42 }
 0x2b1   :  { %456 = vmatprep.subr.bf16.mxu0 %v526_v22 }
 0x2d3   :  { %v208_v43 = vpop.permute.xlu1 %207 }
 0x2d4   :  { %v211_v45 = vmax.f32 %v558_v25, %v208_v43 }
 0x2d5   :  { %v210_v44 = vpop.permute.xlu0 %209 }
 0x2d6   :  { %v212_v47 = vmax.f32 %v560_v27, %v210_v44 }
 0x2d8   :  { %v213_v48 = vpack.c.bf16 %v212_v47, %v211_v45 }
 0x2da   :  { %v214_v46 = vunpack.c.l.bf16 %v213_v48  ;;  %v215_v49 = vunpack.c.h.bf16 %v213_v48  ;;  %453 = vmatmul.mubr.bf16.vlgmr.msra.gmra.mrb[0].mxu0 %v213_v48 }
 0x2db   :  { %457 = vmatpush3.bf16.msra.mxu0 %v610_v50  ;;  %472 = vmatprep.mubr.msk.bf16.mxu0 %vm527_vm5, %v526_v22  ;;  %vm349_vm5 = vcmask 64512  }
 0x2dc   :  { %v217_v51 = vsub.f32 %v212_v47, %v215_v49  ;;  %458 = vmatprep.subr.bf16.mxu0 %v526_v22  ;;  %v216_v52 = vsub.f32 %v211_v45, %v214_v46 }
 0x2de   :  { %v218_v53 = vpack.c.bf16 %v217_v51, %v216_v52 }
 0x2df   :  { %459 = vmatpush3.bf16.msra.mxu0 %v630_v59 }
 0x2e0   :  { %433 = vmatmul.mubr.bf16.vlgmr.msra.gmra.mrb[0].mxu1 %v218_v53  ;;  %460 = vmatprep.subr.bf16.mxu0 %v526_v22  ;;  %v219_v25 = vunpack.c.l.bf16 %v218_v53  ;;  %v220_v27 = vunpack.c.h.bf16 %v218_v53 }
 0x2e2   :  { %v221_v50 = vsub.f32 %v216_v52, %v219_v25  ;;  %v222_v54 = vsub.f32 %v217_v51, %v220_v27 }
 0x2e3   :  { %461 = vmatpush3.bf16.msra.mxu0 %v650_v4 }
 0x2e4   :  { %462 = vmatprep.subr.bf16.mxu0 %v526_v22  ;;  %v223_v55 = vpack.c.bf16 %v222_v54, %v221_v50 }
 0x2e7   :  { %463 = vmatpush3.bf16.msra.mxu0 %v670_v13 }
 0x2e8   :  { %464 = vmatprep.subr.bf16.mxu0 %v526_v22 }
 0x2eb   :  { %465 = vmatpush3.bf16.msra.mxu0 %v183_v23 }
 0x2ec   :  { %466 = vmatprep.subr.bf16.mxu0 %v526_v22 }
 0x2ef   :  { %467 = vmatpush3.bf16.msra.mxu0 %v184_v29 }
 0x2f0   :  { %468 = vmatprep.subr.bf16.mxu0 %v526_v22 }
 0x2f3   :  { %469 = vmatpush3.bf16.msra.mxu0 %v185_v28 }
 0x2f4   :  { %470 = vmatprep.subr.bf16.mxu0 %v526_v22 }
 0x2f7   :  { %471 = vmatpush3.bf16.msra.mxu0 %v186_v42 }
 0x2fa   :  { %473 = vmatmul.mubr.bf16.vlgmr.msra.gmra.mrb[0].mxu0 %v223_v55 }
 0x3b3   :  { %v258_v56 = vpop.f32.mrb[0].mxu1 }
 0x3b4   :  { %v434_v57 = vpop.f32.mrb[1].mxu1 }
 0x3b5   :  { %v261_v58 = vpop.f32.mrb[2].mxu1 }
 0x3b6   :  { %v435_v59 = vpop.f32.mrb[3].mxu1 }
 0x3cd   :  { %v340_v60 = vpop.f32.mrb[0].mxu0 }
 0x3ce   :  { %v476_v61 = vadd.f32 %v340_v60, %v258_v56  ;;  %v474_v62 = vpop.f32.mrb[1].mxu0 }
 0x3cf   :  { %v343_v63 = vpop.f32.mrb[2].mxu0 }
 0x3d0   :  { %350 = vst.msk [vmem:[%s743_s1] sm:$0xff] %vm349_vm5, %v476_v61  ;;  %v477_v0 = vadd.f32 %v343_v63, %v261_v58  ;;  %v475_v1 = vpop.f32.mrb[3].mxu0 }
 0x3d2   :  { %351 = vst.msk [vmem:[%s743_s1 + $0x8] sm:$0xff] %vm349_vm5, %v477_v0 }
 0x3d3   :  { %356 = vsyncpa [#allocation3], 1 }

</bundles_post_ra>
